<compile_context>
chip_gen: v7x
topology: tpu7x:2x2x1
jax: 0.10.0
libtpu: 0.0.40
codegen_flags: <defaults>
</compile_context>

<pallas_src>
import math

import jax
import jax.numpy as jnp
from jax.experimental import pallas as pl
from jax.experimental.pallas import tpu as pltpu


# -----------------------------------------------------------------------------
# helpers
# -----------------------------------------------------------------------------

_SLACK = 8 << 20  # headroom for Mosaic internal scratch


def _round_up(x, m):
    return ((x + m - 1) // m) * m


def _round_down(x, m):
    return (x // m) * m


def _vmem_cap_bytes():
    """~90% of per-core VMEM capacity (128 MiB on v5e/v6e, 64 MiB on v7x)."""
    try:
        cap = int(pltpu.get_tpu_info().vmem_capacity_bytes)
        if cap <= 0:
            cap = 64 << 20
    except Exception:
        cap = 64 << 20  # conservative: assume v7x per-TensorCore VMEM
    return int(cap * 0.90)


def _bias_tile_bytes(cols, itemsize=4):
    # A (1, cols) f32 tile pads to an (8, round_up(cols, 128)) VMEM tile.
    return 8 * _round_up(cols, 128) * itemsize


def _resident_footprint(tm, d_model, d_ff, x_isz, out_isz, weight_buffers):
    tm_p = _round_up(tm, 8)
    dm_p = _round_up(d_model, 128)
    df_p = _round_up(d_ff, 128)
    w = weight_buffers * (_round_up(d_model, 8) * df_p
                          + _round_up(d_ff, 8) * dm_p) * 2            # bf16 weights
    b = weight_buffers * (_bias_tile_bytes(d_ff) + _bias_tile_bytes(d_model))
    xio = 2 * tm_p * dm_p * x_isz + 2 * tm_p * dm_p * out_isz         # pipelined tiles
    h = tm_p * df_p * (4 + 2)                                         # f32 h + bf16 copy
    return w + b + xio + h


def _stream_footprint(tm, d_model, d_ff, t_ff, x_isz, out_isz):
    tm_p = _round_up(tm, 8)
    dm_p = _round_up(d_model, 128)
    tf_p = _round_up(t_ff, 128)
    w = 2 * (_round_up(d_model, 8) * tf_p + _round_up(t_ff, 8) * dm_p) * 2
    b = 2 * _bias_tile_bytes(t_ff) + _bias_tile_bytes(d_model)
    xio = 2 * tm_p * dm_p * x_isz + 2 * tm_p * dm_p * out_isz
    acc = tm_p * dm_p * 4
    h = tm_p * tf_p * (4 + 2)
    return w + b + xio + acc + h


def _spec(shape, index_map, single_buffered):
    """BlockSpec; optionally request a single VMEM buffer for operands whose
    block index never changes (halves resident-weight VMEM)."""
    if single_buffered:
        return pl.BlockSpec(shape, index_map, pipeline_mode=pl.Buffered(1))
    return pl.BlockSpec(shape, index_map)


# -----------------------------------------------------------------------------
# kernels
# -----------------------------------------------------------------------------

def _ffn_resident_kernel(x_ref, w1_ref, b1_ref, w2_ref, b2_ref, o_ref):
    # linear1 (MXU bf16 operands, f32 accumulate) + bias + ReLU
    h = jnp.dot(x_ref[...], w1_ref[...], preferred_element_type=jnp.float32)
    h = jnp.maximum(h + b1_ref[...], 0.0)
    # dropout: nn.Dropout is identity in eval mode; reproduced as identity.
    # TODO(synk): training-mode dropout (pltpu.prng_seed + prng_random_bits mask
    #             + 1/(1-p) scale) not wired up.
    out = jnp.dot(h.astype(jnp.bfloat16), w2_ref[...],
                  preferred_element_type=jnp.float32) + b2_ref[...]
    o_ref[...] = out.astype(o_ref.dtype)


def _ffn_stream_kernel(x_ref, w1_ref, b1_ref, w2_ref, b2_ref, o_ref, acc_ref):
    # d_ff streamed in slices; f32 accumulator for the second matmul.
    f = pl.program_id(1)

    @pl.when(f == 0)
    def _():
        acc_ref[...] = jnp.zeros_like(acc_ref)

    h = jnp.dot(x_ref[...], w1_ref[...], preferred_element_type=jnp.float32)
    h = jnp.maximum(h + b1_ref[...], 0.0)
    acc_ref[...] += jnp.dot(h.astype(jnp.bfloat16), w2_ref[...],
                            preferred_element_type=jnp.float32)

    @pl.when(f == pl.num_programs(1) - 1)
    def _():
        o_ref[...] = (acc_ref[...] + b2_ref[...]).astype(o_ref.dtype)


# -----------------------------------------------------------------------------
# pallas_call wrappers
# -----------------------------------------------------------------------------

def _ffn_resident_call(x2d, w1b, b1f, w2b, b2f, out_dtype, tm, single_buffered):
    N, d_model = x2d.shape
    d_ff = w1b.shape[1]
    grid_m = pl.cdiv(N, tm)
    cap = _vmem_cap_bytes()
    footprint = _resident_footprint(tm, d_model, d_ff, x2d.dtype.itemsize,
                                    jnp.dtype(out_dtype).itemsize,
                                    weight_buffers=1 if single_buffered else 2)
    vmem_limit = max(16 << 20, min(cap, footprint + _SLACK))

    cost = pl.CostEstimate(
        flops=4 * N * d_model * d_ff,
        transcendentals=0,
        bytes_accessed=(x2d.size * x2d.dtype.itemsize
                        + w1b.size * 2 + w2b.size * 2
                        + b1f.size * 4 + b2f.size * 4
                        + N * d_model * jnp.dtype(out_dtype).itemsize),
    )

    return pl.pallas_call(
        _ffn_resident_kernel,
        out_shape=jax.ShapeDtypeStruct((N, d_model), out_dtype),
        grid_spec=pltpu.PrefetchScalarGridSpec(
            num_scalar_prefetch=0,
            grid=(grid_m,),
            in_specs=[
                pl.BlockSpec((tm, d_model), lambda i: (i, 0)),              # x tile (pipelined)
                _spec((d_model, d_ff), lambda i: (0, 0), single_buffered),  # w1 resident
                _spec((1, d_ff), lambda i: (0, 0), single_buffered),        # b1 resident
                _spec((d_ff, d_model), lambda i: (0, 0), single_buffered),  # w2 resident
                _spec((1, d_model), lambda i: (0, 0), single_buffered),     # b2 resident
            ],
            out_specs=pl.BlockSpec((tm, d_model), lambda i: (i, 0)),
        ),
        compiler_params=pltpu.CompilerParams(
            dimension_semantics=("parallel",),
            vmem_limit_bytes=vmem_limit,
        ),
        cost_estimate=cost,
    )(x2d, w1b, b1f, w2b, b2f)


def _ffn_stream_call(x2d, w1b, b1f, w2b, b2f, out_dtype, tm, t_ff, single_buffered):
    N, d_model = x2d.shape
    d_ff = w1b.shape[1]
    grid_m = pl.cdiv(N, tm)
    grid_f = d_ff // t_ff
    cap = _vmem_cap_bytes()
    footprint = _stream_footprint(tm, d_model, d_ff, t_ff, x2d.dtype.itemsize,
                                  jnp.dtype(out_dtype).itemsize)
    vmem_limit = max(16 << 20, min(cap, footprint + _SLACK))

    cost = pl.CostEstimate(
        flops=4 * N * d_model * d_ff,
        transcendentals=0,
        bytes_accessed=(x2d.size * x2d.dtype.itemsize
                        + grid_m * (w1b.size * 2 + w2b.size * 2 + b1f.size * 4)
                        + b2f.size * 4
                        + N * d_model * jnp.dtype(out_dtype).itemsize),
    )

    return pl.pallas_call(
        _ffn_stream_kernel,
        out_shape=jax.ShapeDtypeStruct((N, d_model), out_dtype),
        grid_spec=pltpu.PrefetchScalarGridSpec(
            num_scalar_prefetch=0,
            grid=(grid_m, grid_f),
            in_specs=[
                pl.BlockSpec((tm, d_model), lambda i, f: (i, 0)),            # x (held across f)
                pl.BlockSpec((d_model, t_ff), lambda i, f: (0, f)),          # w1 slice (pipelined)
                pl.BlockSpec((1, t_ff), lambda i, f: (0, f)),                # b1 slice
                pl.BlockSpec((t_ff, d_model), lambda i, f: (f, 0)),          # w2 slice (pipelined)
                _spec((1, d_model), lambda i, f: (0, 0), single_buffered),   # b2 resident
            ],
            out_specs=pl.BlockSpec((tm, d_model), lambda i, f: (i, 0)),
            scratch_shapes=[pltpu.VMEM((tm, d_model), jnp.float32)],
        ),
        compiler_params=pltpu.CompilerParams(
            dimension_semantics=("parallel", "arbitrary"),
            vmem_limit_bytes=vmem_limit,
        ),
        cost_estimate=cost,
    )(x2d, w1b, b1f, w2b, b2f)


# -----------------------------------------------------------------------------
# public entry point
# -----------------------------------------------------------------------------

def feed_forward(x, w1, b1, w2, b2, *, tile_m=512, force_stream=False, t_ff=None):
    """x: [B, S, d_model]; w1: [d_model, d_ff]; b1: [d_ff]/[1, d_ff];
       w2: [d_ff, d_model]; b2: [d_model]/[1, d_model] -> [B, S, d_model].
       Eval-mode FFN: linear2(dropout(relu(linear1(x)))), dropout = identity."""
    B, S, d_model = x.shape
    d_ff = w1.shape[1]
    N = B * S
    out_dtype = x.dtype

    # bf16 MXU operands; cast x at the HBM boundary (halves x-tile DMA/VMEM).
    # Biases stay f32 for the f32-accumulator adds.
    x2d = x.reshape(N, d_model).astype(jnp.bfloat16)
    w1b = w1.astype(jnp.bfloat16)
    w2b = w2.astype(jnp.bfloat16)
    b1f = b1.reshape(1, d_ff).astype(jnp.float32)
    b2f = b2.reshape(1, d_model).astype(jnp.float32)

    # Row tile: full-N for small inputs; otherwise a multiple of 256 (fills the
    # 256x256 MXU on v6e/v7x, already ideal on v5e's 128x128), capped so that
    # grid_m >= 2 whenever N is large enough (keeps both v7x TCs busy).
    if N <= 256:
        tm = N
    else:
        tm = min(tile_m, max(256, _round_down(N // 2, 256)))

    x_isz = x2d.dtype.itemsize
    out_isz = jnp.dtype(out_dtype).itemsize
    cap = _vmem_cap_bytes()
    resident_fits = (_resident_footprint(tm, d_model, d_ff, x_isz, out_isz,
                                         weight_buffers=1) + _SLACK <= cap)

    if force_stream or not resident_fits:
        # d_ff-streaming fallback (v7x / large d_ff): stream w1/w2 column slices.
        if t_ff is None:
            cands = sorted({c for c in (d_ff, 4096, 2048, 1024, 512, 256, 128)
                            if c <= d_ff and d_ff % c == 0}, reverse=True)
            t_ff = cands[-1]
            for c in cands:
                if _stream_footprint(tm, d_model, d_ff, c, x_isz, out_isz) + _SLACK <= cap:
                    t_ff = c
                    break
        try:
            out2d = jax.block_until_ready(
                _ffn_stream_call(x2d, w1b, b1f, w2b, b2f, out_dtype, tm, t_ff,
                                 single_buffered=True))
        except Exception:
            out2d = _ffn_stream_call(x2d, w1b, b1f, w2b, b2f, out_dtype, tm, t_ff,
                                     single_buffered=False)
    else:
        try:
            out2d = jax.block_until_ready(
                _ffn_resident_call(x2d, w1b, b1f, w2b, b2f, out_dtype, tm,
                                   single_buffered=True))
        except Exception:
            out2d = _ffn_resident_call(x2d, w1b, b1f, w2b, b2f, out_dtype, tm,
                                       single_buffered=False)

    return out2d.reshape(B, S, d_model)


# -----------------------------------------------------------------------------
# init + reference + self-test
# -----------------------------------------------------------------------------

def init_params(key, d_model, d_ff, dtype=jnp.float32):
    """nn.Linear-style init: U(-1/sqrt(fan_in), 1/sqrt(fan_in)); weights stored
    transposed as (in_features, out_features)."""
    k1, k2, k3, k4 = jax.random.split(key, 4)
    bound1 = 1.0 / math.sqrt(d_model)
    bound2 = 1.0 / math.sqrt(d_ff)
    w1 = jax.random.uniform(k1, (d_model, d_ff), dtype, -bound1, bound1)
    b1 = jax.random.uniform(k2, (1, d_ff), dtype, -bound1, bound1)
    w2 = jax.random.uniform(k3, (d_ff, d_model), dtype, -bound2, bound2)
    b2 = jax.random.uniform(k4, (1, d_model), dtype, -bound2, bound2)
    return w1, b1, w2, b2


def _reference_bf16(x, w1, b1, w2, b2):
    """Plain-JAX reference with matching bf16-operand / f32-accumulate math."""
    B, S, d_model = x.shape
    x2d = x.reshape(-1, d_model).astype(jnp.bfloat16)
    h = jnp.dot(x2d, w1.astype(jnp.bfloat16),
                preferred_element_type=jnp.float32) + b1.reshape(1, -1).astype(jnp.float32)
    h = jnp.maximum(h, 0.0)
    o = jnp.dot(h.astype(jnp.bfloat16), w2.astype(jnp.bfloat16),
                preferred_element_type=jnp.float32) + b2.reshape(1, -1).astype(jnp.float32)
    return o.reshape(B, S, d_model).astype(x.dtype)


if __name__ == "__main__":
    key = jax.random.PRNGKey(0)
    kx, kp, kx2, kp2 = jax.random.split(key, 4)

    # --- test 1: small shapes, weight-resident path --------------------------
    batch, seq, d_model, d_ff = 2, 8, 32, 64
    x = jax.random.normal(kx, (batch, seq, d_model), jnp.float32)
    w1, b1, w2, b2 = init_params(kp, d_model, d_ff)

    out = jax.block_until_ready(feed_forward(x, w1, b1, w2, b2))
    ref = _reference_bf16(x, w1, b1, w2, b2)
    ref_f32 = (jnp.maximum(x.reshape(-1, d_model) @ w1 + b1, 0.0) @ w2 + b2
               ).reshape(batch, seq, d_model)

    assert out.shape == (batch, seq, d_model)
    assert out.dtype == x.dtype
    assert jnp.allclose(out, ref, atol=1e-3, rtol=1e-3)
    assert jnp.allclose(out, ref_f32, atol=5e-2, rtol=5e-2)

    # --- test 2: force the d_ff-streaming fallback path (v7x / large d_ff) ---
    d_model2, d_ff2 = 128, 256
    x2 = jax.random.normal(kx2, (batch, seq, d_model2), jnp.float32)
    p2 = init_params(kp2, d_model2, d_ff2)
    out2 = jax.block_until_ready(
        feed_forward(x2, *p2, force_stream=True, t_ff=128))
    ref2 = _reference_bf16(x2, *p2)
    assert out2.shape == (batch, seq, d_model2)
    assert jnp.allclose(out2, ref2, atol=1e-2, rtol=1e-2)

    print("KERNEL_OK")
</pallas_src>

<mosaic_0001>
module attributes {stable_mosaic.version = 11 : i64} {
  func.func @_ffn_resident_kernel(%arg0: i32, %arg1: memref<16x32xbf16, #tpu.memory_space<vmem>>, %arg2: memref<32x64xbf16, #tpu.memory_space<vmem>>, %arg3: memref<1x64xf32, #tpu.memory_space<vmem>>, %arg4: memref<64x32xbf16, #tpu.memory_space<vmem>>, %arg5: memref<1x32xf32, #tpu.memory_space<vmem>>, %arg6: memref<16x32xf32, #tpu.memory_space<vmem>>) attributes {dimension_semantics = [#tpu.dimension_semantics<parallel>], iteration_bounds = array<i64: 1>, scalar_prefetch = 0 : i64, scratch_operands = 0 : i64, tpu.core_type = #tpu.core_type<tc>, window_params = [{transform_indices = @transform_0, window_bounds = array<i64: 16, 32>}, {pipeline_mode = #tpu.pipeline_mode<synchronous>, transform_indices = @transform_1, window_bounds = array<i64: 32, 64>}, {pipeline_mode = #tpu.pipeline_mode<synchronous>, transform_indices = @transform_2, window_bounds = array<i64: 1, 64>}, {pipeline_mode = #tpu.pipeline_mode<synchronous>, transform_indices = @transform_3, window_bounds = array<i64: 64, 32>}, {pipeline_mode = #tpu.pipeline_mode<synchronous>, transform_indices = @transform_4, window_bounds = array<i64: 1, 32>}, {transform_indices = @transform_5, window_bounds = array<i64: 16, 32>}]} {
    %c0 = arith.constant 0 : index
    %c0_0 = arith.constant 0 : index
    %0 = vector.load %arg1[%c0, %c0_0] : memref<16x32xbf16, #tpu.memory_space<vmem>>, vector<16x32xbf16>
    %c0_1 = arith.constant 0 : index
    %c0_2 = arith.constant 0 : index
    %1 = vector.load %arg2[%c0_1, %c0_2] : memref<32x64xbf16, #tpu.memory_space<vmem>>, vector<32x64xbf16>
    %cst = arith.constant dense<0.000000e+00> : vector<16x64xf32>
    %2 = tpu.matmul %0, %1, %cst {dimension_numbers = #tpu.dot_dimension_numbers<[1], [0], [0], [1], [0, 0, 1, 1], [], []>} : vector<16x32xbf16>, vector<32x64xbf16>, vector<16x64xf32> -> vector<16x64xf32>
    %c0_3 = arith.constant 0 : index
    %c0_4 = arith.constant 0 : index
    %3 = vector.load %arg3[%c0_3, %c0_4] : memref<1x64xf32, #tpu.memory_space<vmem>>, vector<1x64xf32>
    %4 = vector.broadcast %3 : vector<1x64xf32> to vector<16x64xf32>
    %5 = arith.addf %2, %4 : vector<16x64xf32>
    %cst_5 = arith.constant 0.000000e+00 : f32
    %6 = vector.broadcast %cst_5 : f32 to vector<16x64xf32>
    %7 = arith.maximumf %5, %6 : vector<16x64xf32>
    %8 = arith.truncf %7 : vector<16x64xf32> to vector<16x64xbf16>
    %c0_6 = arith.constant 0 : index
    %c0_7 = arith.constant 0 : index
    %9 = vector.load %arg4[%c0_6, %c0_7] : memref<64x32xbf16, #tpu.memory_space<vmem>>, vector<64x32xbf16>
    %cst_8 = arith.constant dense<0.000000e+00> : vector<16x32xf32>
    %10 = tpu.matmul %8, %9, %cst_8 {dimension_numbers = #tpu.dot_dimension_numbers<[1], [0], [0], [1], [0, 0, 1, 1], [], []>} : vector<16x64xbf16>, vector<64x32xbf16>, vector<16x32xf32> -> vector<16x32xf32>
    %c0_9 = arith.constant 0 : index
    %c0_10 = arith.constant 0 : index
    %11 = vector.load %arg5[%c0_9, %c0_10] : memref<1x32xf32, #tpu.memory_space<vmem>>, vector<1x32xf32>
    %12 = vector.broadcast %11 : vector<1x32xf32> to vector<16x32xf32>
    %13 = arith.addf %10, %12 : vector<16x32xf32>
    %c0_11 = arith.constant 0 : index
    %c0_12 = arith.constant 0 : index
    %14 = vector.load %arg6[%c0_11, %c0_12] : memref<16x32xf32, #tpu.memory_space<vmem>>, vector<16x32xf32>
    tpu.vector_store %arg6[%c0_11, %c0_12], %13 {strides = array<i32>} : memref<16x32xf32, #tpu.memory_space<vmem>>, vector<16x32xf32>,
    return
  }
  func.func @transform_0(%arg0: i32) -> (i32, i32) {
    %c0_i32 = arith.constant 0 : i32
    %c0_i32_0 = arith.constant 0 : i32
    return %arg0, %c0_i32 : i32, i32
  }
  func.func @transform_1(%arg0: i32) -> (i32, i32) {
    %c0_i32 = arith.constant 0 : i32
    %c0_i32_0 = arith.constant 0 : i32
    %c0_i32_1 = arith.constant 0 : i32
    return %c0_i32, %c0_i32_0 : i32, i32
  }
  func.func @transform_2(%arg0: i32) -> (i32, i32) {
    %c0_i32 = arith.constant 0 : i32
    %c0_i32_0 = arith.constant 0 : i32
    %c0_i32_1 = arith.constant 0 : i32
    return %c0_i32, %c0_i32_0 : i32, i32
  }
  func.func @transform_3(%arg0: i32) -> (i32, i32) {
    %c0_i32 = arith.constant 0 : i32
    %c0_i32_0 = arith.constant 0 : i32
    %c0_i32_1 = arith.constant 0 : i32
    return %c0_i32, %c0_i32_0 : i32, i32
  }
  func.func @transform_4(%arg0: i32) -> (i32, i32) {
    %c0_i32 = arith.constant 0 : i32
    %c0_i32_0 = arith.constant 0 : i32
    %c0_i32_1 = arith.constant 0 : i32
    return %c0_i32, %c0_i32_0 : i32, i32
  }
  func.func @transform_5(%arg0: i32) -> (i32, i32) {
    %c0_i32 = arith.constant 0 : i32
    %c0_i32_0 = arith.constant 0 : i32
    return %arg0, %c0_i32 : i32, i32
  }
}

module attributes {stable_mosaic.version = 11 : i64} {
  func.func @_ffn_resident_kernel(%arg0: i32, %arg1: memref<16x32xbf16, #tpu.memory_space<vmem>>, %arg2: memref<32x64xbf16, #tpu.memory_space<vmem>>, %arg3: memref<1x64xf32, #tpu.memory_space<vmem>>, %arg4: memref<64x32xbf16, #tpu.memory_space<vmem>>, %arg5: memref<1x32xf32, #tpu.memory_space<vmem>>, %arg6: memref<16x32xf32, #tpu.memory_space<vmem>>) attributes {dimension_semantics = [#tpu.dimension_semantics<parallel>], iteration_bounds = array<i64: 1>, scalar_prefetch = 0 : i64, scratch_operands = 0 : i64, tpu.core_type = #tpu.core_type<tc>, window_params = [{transform_indices = @transform_0, window_bounds = array<i64: 16, 32>}, {pipeline_mode = #tpu.pipeline_mode<synchronous>, transform_indices = @transform_1, window_bounds = array<i64: 32, 64>}, {pipeline_mode = #tpu.pipeline_mode<synchronous>, transform_indices = @transform_2, window_bounds = array<i64: 1, 64>}, {pipeline_mode = #tpu.pipeline_mode<synchronous>, transform_indices = @transform_3, window_bounds = array<i64: 64, 32>}, {pipeline_mode = #tpu.pipeline_mode<synchronous>, transform_indices = @transform_4, window_bounds = array<i64: 1, 32>}, {transform_indices = @transform_5, window_bounds = array<i64: 16, 32>}]} {
    %c0 = arith.constant 0 : index
    %c0_0 = arith.constant 0 : index
    %0 = vector.load %arg1[%c0, %c0_0] : memref<16x32xbf16, #tpu.memory_space<vmem>>, vector<16x32xbf16>
    %c0_1 = arith.constant 0 : index
    %c0_2 = arith.constant 0 : index
    %1 = vector.load %arg2[%c0_1, %c0_2] : memref<32x64xbf16, #tpu.memory_space<vmem>>, vector<32x64xbf16>
    %cst = arith.constant dense<0.000000e+00> : vector<16x64xf32>
    %2 = tpu.matmul %0, %1, %cst {dimension_numbers = #tpu.dot_dimension_numbers<[1], [0], [0], [1], [0, 0, 1, 1], [], []>} : vector<16x32xbf16>, vector<32x64xbf16>, vector<16x64xf32> -> vector<16x64xf32>
    %c0_3 = arith.constant 0 : index
    %c0_4 = arith.constant 0 : index
    %3 = vector.load %arg3[%c0_3, %c0_4] : memref<1x64xf32, #tpu.memory_space<vmem>>, vector<1x64xf32>
    %4 = vector.broadcast %3 : vector<1x64xf32> to vector<16x64xf32>
    %5 = arith.addf %2, %4 : vector<16x64xf32>
    %cst_5 = arith.constant 0.000000e+00 : f32
    %6 = vector.broadcast %cst_5 : f32 to vector<16x64xf32>
    %7 = arith.maximumf %5, %6 : vector<16x64xf32>
    %8 = arith.truncf %7 : vector<16x64xf32> to vector<16x64xbf16>
    %c0_6 = arith.constant 0 : index
    %c0_7 = arith.constant 0 : index
    %9 = vector.load %arg4[%c0_6, %c0_7] : memref<64x32xbf16, #tpu.memory_space<vmem>>, vector<64x32xbf16>
    %cst_8 = arith.constant dense<0.000000e+00> : vector<16x32xf32>
    %10 = tpu.matmul %8, %9, %cst_8 {dimension_numbers = #tpu.dot_dimension_numbers<[1], [0], [0], [1], [0, 0, 1, 1], [], []>} : vector<16x64xbf16>, vector<64x32xbf16>, vector<16x32xf32> -> vector<16x32xf32>
    %c0_9 = arith.constant 0 : index
    %c0_10 = arith.constant 0 : index
    %11 = vector.load %arg5[%c0_9, %c0_10] : memref<1x32xf32, #tpu.memory_space<vmem>>, vector<1x32xf32>
    %12 = vector.broadcast %11 : vector<1x32xf32> to vector<16x32xf32>
    %13 = arith.addf %10, %12 : vector<16x32xf32>
    %c0_11 = arith.constant 0 : index
    %c0_12 = arith.constant 0 : index
    %14 = vector.load %arg6[%c0_11, %c0_12] : memref<16x32xf32, #tpu.memory_space<vmem>>, vector<16x32xf32>
    tpu.vector_store %arg6[%c0_11, %c0_12], %13 {strides = array<i32>} : memref<16x32xf32, #tpu.memory_space<vmem>>, vector<16x32xf32>,
    return
  }
  func.func @transform_0(%arg0: i32) -> (i32, i32) {
    %c0_i32 = arith.constant 0 : i32
    %c0_i32_0 = arith.constant 0 : i32
    return %arg0, %c0_i32 : i32, i32
  }
  func.func @transform_1(%arg0: i32) -> (i32, i32) {
    %c0_i32 = arith.constant 0 : i32
    %c0_i32_0 = arith.constant 0 : i32
    %c0_i32_1 = arith.constant 0 : i32
    return %c0_i32, %c0_i32_0 : i32, i32
  }
  func.func @transform_2(%arg0: i32) -> (i32, i32) {
    %c0_i32 = arith.constant 0 : i32
    %c0_i32_0 = arith.constant 0 : i32
    %c0_i32_1 = arith.constant 0 : i32
    return %c0_i32, %c0_i32_0 : i32, i32
  }
  func.func @transform_3(%arg0: i32) -> (i32, i32) {
    %c0_i32 = arith.constant 0 : i32
    %c0_i32_0 = arith.constant 0 : i32
    %c0_i32_1 = arith.constant 0 : i32
    return %c0_i32, %c0_i32_0 : i32, i32
  }
  func.func @transform_4(%arg0: i32) -> (i32, i32) {
    %c0_i32 = arith.constant 0 : i32
    %c0_i32_0 = arith.constant 0 : i32
    %c0_i32_1 = arith.constant 0 : i32
    return %c0_i32, %c0_i32_0 : i32, i32
  }
  func.func @transform_5(%arg0: i32) -> (i32, i32) {
    %c0_i32 = arith.constant 0 : i32
    %c0_i32_0 = arith.constant 0 : i32
    return %arg0, %c0_i32 : i32, i32
  }
}

</mosaic_0001>

<bundles_post_ra>
// kernel: tpu_custom_call.1
= control target key start
LH: loop header
LB: loop body
LE: loop exit
PB: predicated region body
PF: predicated region fallthrough
CT: control target
= control target key end

     0   :  { %v277_v1 = vmov 0.0   ;;  %vm278_vm0 = vmmov 0   ;;  %vm52_vm1 = vcmask 261120   ;;  %s354_s0 = inlined_call_operand.vmem [shape: bf16[16,32], index: 0, kind: input, shape index: {}]   ;;  %s355_s1 = inlined_call_operand.vmem [shape: bf16[32,64], index: 1, kind: input, shape index: {}]   ;;  %s356_s2 = inlined_call_operand.vmem [shape: f32[1,64], index: 2, kind: input, shape index: {}]   ;;  %s357_s3 = inlined_call_operand.vmem [shape: bf16[64,32], index: 3, kind: input, shape index: {}]   ;;  %s358_s4 = inlined_call_operand.vmem [shape: f32[1,32], index: 4, kind: input, shape index: {}]   ;;  %s359_s5 = inlined_call_operand.hbm [shape: f32[16,32], index: 5, kind: output, shape index: {}]  }
   0x1   :  { %v246_v0 = vld [vmem:[%s355_s1] sm:$0xff]   ;;  %221 = vmatprep.subr.bf16.mxu0 %v277_v1  ;;  %229 = vmatprep.subr.bf16.mxu1 %v277_v1  ;;  %v247_v2 = vld [vmem:[%s355_s1 + $0x8] sm:$0xff]  }
   0x2   :  { %222 = vmatpush3.bf16.msra.mxu0 %v246_v0  ;;  %225 = vmatprep.mubr.msk.bf16.mxu0 %vm278_vm0, %v277_v1  ;;  %v249_v3 = vld [vmem:[%s357_s3] sm:$0xff]   ;;  %v250_v5 = vld [vmem:[%s357_s3 + $0x8] sm:$0xff]  }
   0x3   :  { %223 = vmatprep.subr.bf16.mxu0 %v277_v1  ;;  %237 = vmatprep.mubr.msk.bf16.mxu1 %vm278_vm0, %v277_v1  ;;  %v248_v4 = vld [vmem:[%s354_s0] sm:$0xff]  }
   0x4   :  { %230 = vmatpush3.bf16.msra.mxu1 %v249_v3 }
   0x5   :  { %231 = vmatprep.subr.bf16.mxu1 %v277_v1 }
   0x6   :  { %224 = vmatpush3.bf16.msra.mxu0 %v247_v2 }
   0x7   :  { %10 = vsyncpa [#allocation3], 0  ;;  %v251_v6 = vld [vmem:[%s357_s3 + $0x10] sm:$0xff]   ;;  %v252_v7 = vld [vmem:[%s357_s3 + $0x18] sm:$0xff]   ;;  %vm139_vm2 = vcmask 523264   ;;  %s279_s3 = smov [#allocation2]  }
   0x8   :  { %232 = vmatpush3.bf16.msra.mxu1 %v250_v5  ;;  %v202_v8 = vld [vmem:[%s356_s2] ss:$0 sm:$0xff]  ;;  %s191_s9 = sshll.u32 %s279_s3, 4  ;;  %s192_s9 = int_to_ptr.vmem [resolvable:$true] %s191_s9 }
   0x9   :  { %226 = vmatmul.mubr.msk.bf16.vlgmr.msra.gmra.mrb[0].mxu0 %vm52_vm1, %v248_v4  ;;  %233 = vmatprep.subr.bf16.mxu1 %v277_v1  ;;  %v207_v18 = vld [vmem:[%s358_s4] ss:$0 sm:$0xff]  ;;  %s253_s2 = scalar_lea.vmem %s192_s9, 256  ;;  %p258_p1 = scmp.lt.s32.totalorder %s192_s9, %s192_s9 }
   0xa   :  { %p254_p0 = scmp.ne.s32.totalorder %s192_s9, %s253_s2  ;;  %p259_p2 = scmp.lt.s32.totalorder %s253_s2, %s253_s2 }
   0xc   :  { %234 = vmatpush3.bf16.msra.mxu1 %v251_v6  ;;  %p260_p3 = por %p259_p2, %p258_p1 }
   0xd   :  { %235 = vmatprep.subr.bf16.mxu1 %v277_v1 }
   0xe   :  { %p261_p4 = pnand %p260_p3, %p254_p0 }
  0x10   :  { %236 = vmatpush3.bf16.msra.mxu1 %v252_v7 }
  0xdc   :  { %v90_v9 = vpop.f32.mrb[0].mxu0 }
  0xdd   :  { %v91_v10 = vadd.f32 %v202_v8, %v90_v9  ;;  %v227_v11 = vpop.f32.mrb[1].mxu0 }
  0xde   :  { %v93_v12 = vpop.f32.mrb[2].mxu0 }
  0xdf   :  { %v94_v13 = vadd.f32 %v202_v8, %v93_v12  ;;  %v228_v14 = vpop.f32.mrb[3].mxu0  ;;  %v97_v15 = vmax.f32 %v91_v10, 0.0 }
  0xe1   :  { %v98_v16 = vmax.f32 %v94_v13, 0.0 }
  0xe3   :  { %v99_v17 = vpack.c.bf16 %v98_v16, %v97_v15 }
  0xe5   :  { %238 = vmatmul.mubr.msk.bf16.vlgmr.msra.gmra.mrb[0].mxu1 %vm139_vm2, %v99_v17 }
 0x1b8   :  { %v177_v19 = vpop.f32.mrb[0].mxu1 }
 0x1b9   :  { %v178_v20 = vadd.f32 %v207_v18, %v177_v19  ;;  %v239_v21 = vpop.f32.mrb[1].mxu1 }
 0x1ba   :  { %v180_v22 = vpop.f32.mrb[2].mxu1 }
 0x1bb   :  { %184 = vst.msk [vmem:[#allocation2] sm:$0xff] %vm52_vm1, %v178_v20  ;;  %v181_v23 = vadd.f32 %v207_v18, %v180_v22  ;;  %v240_v24 = vpop.f32.mrb[3].mxu1 }
 0x1bd   :  { %185 = vst.msk [vmem:[#allocation2 + $0x8] sm:$0xff] %vm52_vm1, %v181_v23 }
 0x1be   :  { %264 = shalt.err (!%p261_p4)
}
 0x1bf   :  { %s265_s11 = scalar_lea.hbm %s359_s5, 256 }
 0x1c0   :  { %p266_p5 = scmp.ne.s32.totalorder %s359_s5, %s265_s11  ;;  %p269_p6 = scmp.lt.u32.totalorder %s265_s11, %s359_s5 }
 0x1c2   :  { %p271_p7 = pnand %p269_p6, %p266_p5 }
 0x1c4   :  { %274 = shalt.err (!%p271_p7)
}
 0x1c5   :  { %s280_s16 = smov 128   ;;  %s281_s17 = smov 8  }
 0x1c6   :  { %197 = dma.vmem_to_hbm [thread:$0]  %s192_s9, 256, %s359_s5, [#allocation3], %s280_s16, %s280_s16, %s281_s17  }
 0x1c7   :  { %275 = dma.done.wait [#allocation3], 256  }
 0x1c8   :  { %276 = vsyncadd [#allocation3], 4294967040 }
 0x1c9   :  { %201 = vsyncpa [#allocation3], 1 }

// kernel: tpu_custom_call.1
= control target key start
LH: loop header
LB: loop body
LE: loop exit
PB: predicated region body
PF: predicated region fallthrough
CT: control target
= control target key end

     0   :  { %v277_v1 = vmov 0.0   ;;  %vm278_vm0 = vmmov 0   ;;  %vm52_vm1 = vcmask 261120   ;;  %s354_s0 = inlined_call_operand.vmem [shape: bf16[16,32], index: 0, kind: input, shape index: {}]   ;;  %s355_s1 = inlined_call_operand.vmem [shape: bf16[32,64], index: 1, kind: input, shape index: {}]   ;;  %s356_s2 = inlined_call_operand.vmem [shape: f32[1,64], index: 2, kind: input, shape index: {}]   ;;  %s357_s3 = inlined_call_operand.vmem [shape: bf16[64,32], index: 3, kind: input, shape index: {}]   ;;  %s358_s4 = inlined_call_operand.vmem [shape: f32[1,32], index: 4, kind: input, shape index: {}]   ;;  %s359_s5 = inlined_call_operand.hbm [shape: f32[16,32], index: 5, kind: output, shape index: {}]  }
   0x1   :  { %v246_v0 = vld [vmem:[%s355_s1] sm:$0xff]   ;;  %221 = vmatprep.subr.bf16.mxu0 %v277_v1  ;;  %229 = vmatprep.subr.bf16.mxu1 %v277_v1  ;;  %v247_v2 = vld [vmem:[%s355_s1 + $0x8] sm:$0xff]  }
   0x2   :  { %222 = vmatpush3.bf16.msra.mxu0 %v246_v0  ;;  %225 = vmatprep.mubr.msk.bf16.mxu0 %vm278_vm0, %v277_v1  ;;  %v249_v3 = vld [vmem:[%s357_s3] sm:$0xff]   ;;  %v250_v5 = vld [vmem:[%s357_s3 + $0x8] sm:$0xff]  }
   0x3   :  { %223 = vmatprep.subr.bf16.mxu0 %v277_v1  ;;  %237 = vmatprep.mubr.msk.bf16.mxu1 %vm278_vm0, %v277_v1  ;;  %v248_v4 = vld [vmem:[%s354_s0] sm:$0xff]  }
   0x4   :  { %230 = vmatpush3.bf16.msra.mxu1 %v249_v3 }
   0x5   :  { %231 = vmatprep.subr.bf16.mxu1 %v277_v1 }
   0x6   :  { %224 = vmatpush3.bf16.msra.mxu0 %v247_v2 }
   0x7   :  { %10 = vsyncpa [#allocation3], 0  ;;  %v251_v6 = vld [vmem:[%s357_s3 + $0x10] sm:$0xff]   ;;  %v252_v7 = vld [vmem:[%s357_s3 + $0x18] sm:$0xff]   ;;  %vm139_vm2 = vcmask 523264   ;;  %s279_s3 = smov [#allocation2]  }
   0x8   :  { %232 = vmatpush3.bf16.msra.mxu1 %v250_v5  ;;  %v202_v8 = vld [vmem:[%s356_s2] ss:$0 sm:$0xff]  ;;  %s191_s9 = sshll.u32 %s279_s3, 4  ;;  %s192_s9 = int_to_ptr.vmem [resolvable:$true] %s191_s9 }
   0x9   :  { %226 = vmatmul.mubr.msk.bf16.vlgmr.msra.gmra.mrb[0].mxu0 %vm52_vm1, %v248_v4  ;;  %233 = vmatprep.subr.bf16.mxu1 %v277_v1  ;;  %v207_v18 = vld [vmem:[%s358_s4] ss:$0 sm:$0xff]  ;;  %s253_s2 = scalar_lea.vmem %s192_s9, 256  ;;  %p258_p1 = scmp.lt.s32.totalorder %s192_s9, %s192_s9 }
   0xa   :  { %p254_p0 = scmp.ne.s32.totalorder %s192_s9, %s253_s2  ;;  %p259_p2 = scmp.lt.s32.totalorder %s253_s2, %s253_s2 }
   0xc   :  { %234 = vmatpush3.bf16.msra.mxu1 %v251_v6  ;;  %p260_p3 = por %p259_p2, %p258_p1 }
   0xd   :  { %235 = vmatprep.subr.bf16.mxu1 %v277_v1 }
   0xe   :  { %p261_p4 = pnand %p260_p3, %p254_p0 }
  0x10   :  { %236 = vmatpush3.bf16.msra.mxu1 %v252_v7 }
  0xdc   :  { %v90_v9 = vpop.f32.mrb[0].mxu0 }
  0xdd   :  { %v91_v10 = vadd.f32 %v202_v8, %v90_v9  ;;  %v227_v11 = vpop.f32.mrb[1].mxu0 }
  0xde   :  { %v93_v12 = vpop.f32.mrb[2].mxu0 }
  0xdf   :  { %v94_v13 = vadd.f32 %v202_v8, %v93_v12  ;;  %v228_v14 = vpop.f32.mrb[3].mxu0  ;;  %v97_v15 = vmax.f32 %v91_v10, 0.0 }
  0xe1   :  { %v98_v16 = vmax.f32 %v94_v13, 0.0 }
  0xe3   :  { %v99_v17 = vpack.c.bf16 %v98_v16, %v97_v15 }
  0xe5   :  { %238 = vmatmul.mubr.msk.bf16.vlgmr.msra.gmra.mrb[0].mxu1 %vm139_vm2, %v99_v17 }
 0x1b8   :  { %v177_v19 = vpop.f32.mrb[0].mxu1 }
 0x1b9   :  { %v178_v20 = vadd.f32 %v207_v18, %v177_v19  ;;  %v239_v21 = vpop.f32.mrb[1].mxu1 }
 0x1ba   :  { %v180_v22 = vpop.f32.mrb[2].mxu1 }
 0x1bb   :  { %184 = vst.msk [vmem:[#allocation2] sm:$0xff] %vm52_vm1, %v178_v20  ;;  %v181_v23 = vadd.f32 %v207_v18, %v180_v22  ;;  %v240_v24 = vpop.f32.mrb[3].mxu1 }
 0x1bd   :  { %185 = vst.msk [vmem:[#allocation2 + $0x8] sm:$0xff] %vm52_vm1, %v181_v23 }
 0x1be   :  { %264 = shalt.err (!%p261_p4)
}
 0x1bf   :  { %s265_s11 = scalar_lea.hbm %s359_s5, 256 }
 0x1c0   :  { %p266_p5 = scmp.ne.s32.totalorder %s359_s5, %s265_s11  ;;  %p269_p6 = scmp.lt.u32.totalorder %s265_s11, %s359_s5 }
 0x1c2   :  { %p271_p7 = pnand %p269_p6, %p266_p5 }
 0x1c4   :  { %274 = shalt.err (!%p271_p7)
}
 0x1c5   :  { %s280_s16 = smov 128   ;;  %s281_s17 = smov 8  }
 0x1c6   :  { %197 = dma.vmem_to_hbm [thread:$0]  %s192_s9, 256, %s359_s5, [#allocation3], %s280_s16, %s280_s16, %s281_s17  }
 0x1c7   :  { %275 = dma.done.wait [#allocation3], 256  }
 0x1c8   :  { %276 = vsyncadd [#allocation3], 4294967040 }
 0x1c9   :  { %201 = vsyncpa [#allocation3], 1 }

</bundles_post_ra>
